<compile_context>
chip_gen: v7x
topology: tpu7x:2x2x1
jax: 0.10.0
libtpu: 0.0.40
codegen_flags: <defaults>
</compile_context>

<pallas_src>
import jax
import jax.numpy as jnp
from jax import lax
from jax.experimental import pallas as pl
from jax.experimental.pallas import tpu as pltpu

TAU_ALIGNMENT = 0.1
NORM_EPS = 1e-7
_NEG_INF = -1e30


def _round_up(x: int, m: int) -> int:
    return ((x + m - 1) // m) * m


def _vmem_budget_bytes() -> int:
    """Generation-aware VMEM budget: ~3/4 of physical, capped at 100 MiB.

    v5e/v6e (128 MiB physical) -> ~96 MiB; v7x (64 MiB physical) -> 48 MiB.
    Falls back to a conservative 48 MiB if the hardware query is unavailable.
    """
    cap = 64 * 1024 * 1024
    try:
        cap = int(pltpu.get_tpu_info().vmem_capacity_bytes)
    except Exception:
        pass
    return int(min(cap * 3 // 4, 100 * 1024 * 1024))


def _pick_tile_rows(batch: int, dp: int, cp: int, budget_bytes: int,
                    tb_max: int) -> int:
    """Largest batch tile whose working set fits the per-generation VMEM budget."""
    cap = min(tb_max, max(16, _round_up(batch, 16)))
    best = 16
    for cand in (16, 32, 64, 128, 256, 384, 512, 768, 1024):
        if cand > cap:
            break
        est = (2 * cand * dp * 4      # double-buffered streamed f32 feature tiles
               + cand * dp * 2        # in-kernel bf16 copy of the feature tile
               + 2 * dp * cp * 2      # resident bf16 weight (worst case 2 buffers)
               + 8 * cp * 4           # resident bias + class-mask rows
               + 6 * cand * cp * 4)   # live (TB, Cp) f32/int32 intermediates
        if est <= budget_bytes:
            best = cand
    return best


def alignment_loss_kernel(feat_ref, wt_ref, b_ref, mask_ref, lab_ref, out_ref):
    """One batch tile: matmul -> L2-normalize -> per-example cross entropy."""
    # Cast the streamed f32 tile to bf16 on the VPU (hidden under DMA).
    feats = feat_ref[...].astype(jnp.bfloat16)          # [TB, Dp]

    # Canonical (TB, Dp) x (Dp, Cp) MXU contraction, f32 accumulation.
    logits = lax.dot_general(
        feats, wt_ref[...], (((1,), (0,)), ((), ())),
        preferred_element_type=jnp.float32) + b_ref[...]  # [TB, Cp] f32

    # normalize_logits('all'): logits / (tau * (||logits||_2 + 1e-7)).
    # Padded classes / padded feature dims contribute exactly 0 to the norm.
    sq = jnp.sum(logits * logits, axis=-1, keepdims=True)            # [TB, 1]
    inv = pl.reciprocal(TAU_ALIGNMENT * (jnp.sqrt(sq) + NORM_EPS),
                        approx=False)                                # exact
    zm = logits * inv + mask_ref[...]    # [TB, Cp]; padded classes -> -1e30

    # CrossEntropy per row.  ||z||_2 <= 1/tau, so z - 1/tau is in [-2/tau, 0]:
    # use the analytic bound instead of a per-row max (saves one cross-lane
    # reduction per tile; exp never over/underflows in f32).
    m = jnp.float32(1.0 / TAU_ALIGNMENT)
    lse = m + jnp.log(jnp.sum(jnp.exp(zm - m), axis=-1, keepdims=True))  # [TB, 1]

    tb, cp = zm.shape
    cls_ids = lax.broadcasted_iota(jnp.int32, (tb, cp), 1)
    true_logit = jnp.sum(jnp.where(cls_ids == lab_ref[...], zm, 0.0),
                         axis=-1, keepdims=True)                         # [TB, 1]

    out_ref[...] = lse - true_logit


def _build_call(tb, dp, cp, bp, num_tiles, vmem_limit, single_buffer_resident):
    resident = ({"pipeline_mode": pl.Buffered(1)}
                if single_buffer_resident else {})
    return pl.pallas_call(
        alignment_loss_kernel,
        out_shape=jax.ShapeDtypeStruct((bp, 1), jnp.float32),
        grid=(num_tiles,),
        in_specs=[
            pl.BlockSpec((tb, dp), lambda i: (i, 0)),              # features: streamed f32
            pl.BlockSpec((dp, cp), lambda i: (0, 0), **resident),  # weight^T: resident bf16
            pl.BlockSpec((1, cp), lambda i: (0, 0), **resident),   # bias:     resident f32
            pl.BlockSpec((1, cp), lambda i: (0, 0), **resident),   # class mask: resident f32
            pl.BlockSpec((tb, 1), lambda i: (i, 0)),               # labels:   streamed
        ],
        out_specs=pl.BlockSpec((tb, 1), lambda i: (i, 0)),          # per-example loss
        compiler_params=pltpu.CompilerParams(
            dimension_semantics=("parallel",),   # independent tiles -> both TCs on v7x
            vmem_limit_bytes=vmem_limit),
    )


def alignment_loss(features, weight, bias, labels, *, tb_max: int = 1024):
    """features: [B, D] f32, weight: [C, D] f32, bias: [C] f32, labels: [B] int.

    Returns the scalar mean cross-entropy of the tau-normalized logits.
    """
    B, D = features.shape
    C = weight.shape[0]

    # Lane-dense class and contraction dims (multiples of 128); batch tile a
    # multiple of 16, batch padded to a whole number of tiles.
    Cp = _round_up(max(C, 1), 128)
    Dp = _round_up(max(D, 1), 128)

    budget = _vmem_budget_bytes()
    TB = _pick_tile_rows(B, Dp, Cp, budget, tb_max)
    Bp = _round_up(B, TB)
    num_tiles = Bp // TB

    # Features stay f32 (single HBM read; cast in-kernel).  Weight: one-time
    # bf16 cast + transpose of a small resident tensor.  Zero padding of D/C is
    # an exact no-op for the dot and the L2 norm.
    f = jnp.pad(features.astype(jnp.float32), ((0, Bp - B), (0, Dp - D)))
    wT = jnp.pad(weight.astype(jnp.bfloat16), ((0, Cp - C), (0, Dp - D))).T
    b = jnp.pad(bias.astype(jnp.float32), (0, Cp - C)).reshape(1, Cp)
    cls_mask = jnp.where(jnp.arange(Cp) < C,
                         jnp.float32(0.0), jnp.float32(_NEG_INF)).reshape(1, Cp)
    lab = jnp.pad(labels.astype(jnp.int32), (0, Bp - B)).reshape(Bp, 1)

    try:
        per_example = _build_call(TB, Dp, Cp, Bp, num_tiles, budget,
                                  single_buffer_resident=True)(f, wT, b,
                                                               cls_mask, lab)
    except Exception:
        # Fallback if pipeline_mode=Buffered(1) is rejected by this Pallas
        # version: default (double-buffered) resident operands.
        per_example = _build_call(TB, Dp, Cp, Bp, num_tiles, budget,
                                  single_buffer_resident=False)(f, wT, b,
                                                                cls_mask, lab)

    # Padded batch rows are sliced away before the mean (trivial XLA reduce).
    return jnp.sum(per_example[:B, 0]) * jnp.float32(1.0 / B)


def alignment_loss_forward(features, weight, bias, labels):
    """Mirrors AlignmentLoss.forward: returns (loss, loss_dict).

    The loss stays a device array (no .item()/float() host sync).
    """
    loss = alignment_loss(features, weight, bias, labels)
    loss_dict = {"stream_loss": loss}
    return loss, loss_dict


def _reference(features, weight, bias, labels):
    # Same bf16 matmul inputs / f32 accumulation as the kernel.
    logits = jnp.dot(features.astype(jnp.bfloat16),
                     weight.astype(jnp.bfloat16).T,
                     preferred_element_type=jnp.float32) + bias
    nrm = jnp.linalg.norm(logits, axis=-1, keepdims=True) + NORM_EPS
    z = logits / (TAU_ALIGNMENT * nrm)
    logz = jax.nn.log_softmax(z, axis=-1)
    return -jnp.mean(logz[jnp.arange(features.shape[0]), labels])


if __name__ == "__main__":
    key = jax.random.PRNGKey(0)
    B, D, C = 8, 32, 16  # batch, feature dim, num classes

    k_feat, k_w, k_b, k_lab = jax.random.split(key, 4)
    features = jax.random.normal(k_feat, (B, D), dtype=jnp.float32)
    bound = 1.0 / (D ** 0.5)  # deterministic Linear-like init
    weight = jax.random.uniform(k_w, (C, D), minval=-bound, maxval=bound,
                                dtype=jnp.float32)
    bias = jax.random.uniform(k_b, (C,), minval=-bound, maxval=bound,
                              dtype=jnp.float32)
    labels = jax.random.randint(k_lab, (B,), 0, C, dtype=jnp.int32)

    loss, loss_dict = alignment_loss_forward(features, weight, bias, labels)
    loss = jax.block_until_ready(loss)

    ref = jax.block_until_ready(_reference(features, weight, bias, labels))
    # bf16 matmul inputs on both sides; exact reciprocal => tight tolerance.
    assert jnp.allclose(loss, ref, rtol=2e-3, atol=2e-3), (loss, ref)

    print("KERNEL_OK")
</pallas_src>

<mosaic_0001>
module attributes {stable_mosaic.version = 11 : i64} {
  func.func @alignment_loss_kernel(%arg0: i32, %arg1: memref<16x128xf32, #tpu.memory_space<vmem>>, %arg2: memref<128x128xbf16, #tpu.memory_space<vmem>>, %arg3: memref<1x128xf32, #tpu.memory_space<vmem>>, %arg4: memref<1x128xf32, #tpu.memory_space<vmem>>, %arg5: memref<16x1xi32, #tpu.memory_space<vmem>>, %arg6: memref<16x1xf32, #tpu.memory_space<vmem>>) attributes {dimension_semantics = [#tpu.dimension_semantics<parallel>], iteration_bounds = array<i64: 1>, scalar_prefetch = 0 : i64, scratch_operands = 0 : i64, tpu.core_type = #tpu.core_type<tc>, window_params = [{transform_indices = @transform_0, window_bounds = array<i64: 16, 128>}, {pipeline_mode = #tpu.pipeline_mode<synchronous>, transform_indices = @transform_1, window_bounds = array<i64: 128, 128>}, {pipeline_mode = #tpu.pipeline_mode<synchronous>, transform_indices = @transform_2, window_bounds = array<i64: 1, 128>}, {pipeline_mode = #tpu.pipeline_mode<synchronous>, transform_indices = @transform_3, window_bounds = array<i64: 1, 128>}, {transform_indices = @transform_4, window_bounds = array<i64: 16, 1>}, {transform_indices = @transform_5, window_bounds = array<i64: 16, 1>}]} {
    %c0 = arith.constant 0 : index
    %c0_0 = arith.constant 0 : index
    %0 = vector.load %arg1[%c0, %c0_0] : memref<16x128xf32, #tpu.memory_space<vmem>>, vector<16x128xf32>
    %1 = arith.truncf %0 : vector<16x128xf32> to vector<16x128xbf16>
    %c0_1 = arith.constant 0 : index
    %c0_2 = arith.constant 0 : index
    %2 = vector.load %arg2[%c0_1, %c0_2] : memref<128x128xbf16, #tpu.memory_space<vmem>>, vector<128x128xbf16>
    %cst = arith.constant dense<0.000000e+00> : vector<16x128xf32>
    %3 = tpu.matmul %1, %2, %cst {dimension_numbers = #tpu.dot_dimension_numbers<[1], [0], [0], [1], [0, 0, 1, 1], [], []>} : vector<16x128xbf16>, vector<128x128xbf16>, vector<16x128xf32> -> vector<16x128xf32>
    %c0_3 = arith.constant 0 : index
    %c0_4 = arith.constant 0 : index
    %4 = vector.load %arg3[%c0_3, %c0_4] : memref<1x128xf32, #tpu.memory_space<vmem>>, vector<1x128xf32>
    %5 = vector.broadcast %4 : vector<1x128xf32> to vector<16x128xf32>
    %6 = arith.addf %3, %5 : vector<16x128xf32>
    %7 = arith.mulf %6, %6 : vector<16x128xf32>
    %cst_5 = arith.constant dense<0.000000e+00> : vector<16xf32>
    %8 = vector.multi_reduction <add>, %7, %cst_5 [1] : vector<16x128xf32> to vector<16xf32>
    %9 = vector.shape_cast %8 : vector<16xf32> to vector<16x1xf32>
    %10 = math.sqrt %9 : vector<16x1xf32>
    %cst_6 = arith.constant 1.000000e-07 : f32
    %11 = vector.broadcast %cst_6 : f32 to vector<16x1xf32>
    %12 = arith.addf %10, %11 : vector<16x1xf32>
    %cst_7 = arith.constant 1.000000e-01 : f32
    %13 = vector.broadcast %cst_7 : f32 to vector<16x1xf32>
    %14 = arith.mulf %13, %12 : vector<16x1xf32>
    %15 = tpu.reciprocal %14 : vector<16x1xf32> -> vector<16x1xf32>
    %16 = vector.broadcast %15 : vector<16x1xf32> to vector<16x128xf32>
    %17 = arith.mulf %6, %16 : vector<16x128xf32>
    %c0_8 = arith.constant 0 : index
    %c0_9 = arith.constant 0 : index
    %18 = vector.load %arg4[%c0_8, %c0_9] : memref<1x128xf32, #tpu.memory_space<vmem>>, vector<1x128xf32>
    %19 = vector.broadcast %18 : vector<1x128xf32> to vector<16x128xf32>
    %20 = arith.addf %17, %19 : vector<16x128xf32>
    %cst_10 = arith.constant 1.000000e+01 : f32
    %21 = vector.broadcast %cst_10 : f32 to vector<16x128xf32>
    %22 = arith.subf %20, %21 : vector<16x128xf32>
    %23 = math.exp %22 : vector<16x128xf32>
    %cst_11 = arith.constant dense<0.000000e+00> : vector<16xf32>
    %24 = vector.multi_reduction <add>, %23, %cst_11 [1] : vector<16x128xf32> to vector<16xf32>
    %25 = vector.shape_cast %24 : vector<16xf32> to vector<16x1xf32>
    %26 = math.log %25 : vector<16x1xf32>
    %cst_12 = arith.constant 1.000000e+01 : f32
    %27 = vector.broadcast %cst_12 : f32 to vector<16x1xf32>
    %28 = arith.addf %27, %26 : vector<16x1xf32>
    %29 = tpu.iota {dimensions = array<i32: 1>} : vector<16x128xi32>
    %c0_13 = arith.constant 0 : index
    %c0_14 = arith.constant 0 : index
    %30 = vector.load %arg5[%c0_13, %c0_14] : memref<16x1xi32, #tpu.memory_space<vmem>>, vector<16x1xi32>
    %31 = vector.broadcast %30 : vector<16x1xi32> to vector<16x128xi32>
    %32 = arith.cmpi eq, %29, %31 : vector<16x128xi32>
    %cst_15 = arith.constant 0.000000e+00 : f32
    %33 = vector.broadcast %cst_15 : f32 to vector<16x128xf32>
    %34 = arith.select %32, %20, %33 : vector<16x128xi1>, vector<16x128xf32>
    %cst_16 = arith.constant dense<0.000000e+00> : vector<16xf32>
    %35 = vector.multi_reduction <add>, %34, %cst_16 [1] : vector<16x128xf32> to vector<16xf32>
    %36 = vector.shape_cast %35 : vector<16xf32> to vector<16x1xf32>
    %37 = arith.subf %28, %36 : vector<16x1xf32>
    %c0_17 = arith.constant 0 : index
    %c0_18 = arith.constant 0 : index
    %38 = vector.load %arg6[%c0_17, %c0_18] : memref<16x1xf32, #tpu.memory_space<vmem>>, vector<16x1xf32>
    tpu.vector_store %arg6[%c0_17, %c0_18], %37 {strides = array<i32>} : memref<16x1xf32, #tpu.memory_space<vmem>>, vector<16x1xf32>,
    return
  }
  func.func @transform_0(%arg0: i32) -> (i32, i32) {
    %c0_i32 = arith.constant 0 : i32
    %c0_i32_0 = arith.constant 0 : i32
    return %arg0, %c0_i32 : i32, i32
  }
  func.func @transform_1(%arg0: i32) -> (i32, i32) {
    %c0_i32 = arith.constant 0 : i32
    %c0_i32_0 = arith.constant 0 : i32
    %c0_i32_1 = arith.constant 0 : i32
    return %c0_i32, %c0_i32_0 : i32, i32
  }
  func.func @transform_2(%arg0: i32) -> (i32, i32) {
    %c0_i32 = arith.constant 0 : i32
    %c0_i32_0 = arith.constant 0 : i32
    %c0_i32_1 = arith.constant 0 : i32
    return %c0_i32, %c0_i32_0 : i32, i32
  }
  func.func @transform_3(%arg0: i32) -> (i32, i32) {
    %c0_i32 = arith.constant 0 : i32
    %c0_i32_0 = arith.constant 0 : i32
    %c0_i32_1 = arith.constant 0 : i32
    return %c0_i32, %c0_i32_0 : i32, i32
  }
  func.func @transform_4(%arg0: i32) -> (i32, i32) {
    %c0_i32 = arith.constant 0 : i32
    %c0_i32_0 = arith.constant 0 : i32
    return %arg0, %c0_i32 : i32, i32
  }
  func.func @transform_5(%arg0: i32) -> (i32, i32) {
    %c0_i32 = arith.constant 0 : i32
    %c0_i32_0 = arith.constant 0 : i32
    return %arg0, %c0_i32 : i32, i32
  }
}

module attributes {stable_mosaic.version = 11 : i64} {
  func.func @alignment_loss_kernel(%arg0: i32, %arg1: memref<16x128xf32, #tpu.memory_space<vmem>>, %arg2: memref<128x128xbf16, #tpu.memory_space<vmem>>, %arg3: memref<1x128xf32, #tpu.memory_space<vmem>>, %arg4: memref<1x128xf32, #tpu.memory_space<vmem>>, %arg5: memref<16x1xi32, #tpu.memory_space<vmem>>, %arg6: memref<16x1xf32, #tpu.memory_space<vmem>>) attributes {dimension_semantics = [#tpu.dimension_semantics<parallel>], iteration_bounds = array<i64: 1>, scalar_prefetch = 0 : i64, scratch_operands = 0 : i64, tpu.core_type = #tpu.core_type<tc>, window_params = [{transform_indices = @transform_0, window_bounds = array<i64: 16, 128>}, {pipeline_mode = #tpu.pipeline_mode<synchronous>, transform_indices = @transform_1, window_bounds = array<i64: 128, 128>}, {pipeline_mode = #tpu.pipeline_mode<synchronous>, transform_indices = @transform_2, window_bounds = array<i64: 1, 128>}, {pipeline_mode = #tpu.pipeline_mode<synchronous>, transform_indices = @transform_3, window_bounds = array<i64: 1, 128>}, {transform_indices = @transform_4, window_bounds = array<i64: 16, 1>}, {transform_indices = @transform_5, window_bounds = array<i64: 16, 1>}]} {
    %c0 = arith.constant 0 : index
    %c0_0 = arith.constant 0 : index
    %0 = vector.load %arg1[%c0, %c0_0] : memref<16x128xf32, #tpu.memory_space<vmem>>, vector<16x128xf32>
    %1 = arith.truncf %0 : vector<16x128xf32> to vector<16x128xbf16>
    %c0_1 = arith.constant 0 : index
    %c0_2 = arith.constant 0 : index
    %2 = vector.load %arg2[%c0_1, %c0_2] : memref<128x128xbf16, #tpu.memory_space<vmem>>, vector<128x128xbf16>
    %cst = arith.constant dense<0.000000e+00> : vector<16x128xf32>
    %3 = tpu.matmul %1, %2, %cst {dimension_numbers = #tpu.dot_dimension_numbers<[1], [0], [0], [1], [0, 0, 1, 1], [], []>} : vector<16x128xbf16>, vector<128x128xbf16>, vector<16x128xf32> -> vector<16x128xf32>
    %c0_3 = arith.constant 0 : index
    %c0_4 = arith.constant 0 : index
    %4 = vector.load %arg3[%c0_3, %c0_4] : memref<1x128xf32, #tpu.memory_space<vmem>>, vector<1x128xf32>
    %5 = vector.broadcast %4 : vector<1x128xf32> to vector<16x128xf32>
    %6 = arith.addf %3, %5 : vector<16x128xf32>
    %7 = arith.mulf %6, %6 : vector<16x128xf32>
    %cst_5 = arith.constant dense<0.000000e+00> : vector<16xf32>
    %8 = vector.multi_reduction <add>, %7, %cst_5 [1] : vector<16x128xf32> to vector<16xf32>
    %9 = vector.shape_cast %8 : vector<16xf32> to vector<16x1xf32>
    %10 = math.sqrt %9 : vector<16x1xf32>
    %cst_6 = arith.constant 1.000000e-07 : f32
    %11 = vector.broadcast %cst_6 : f32 to vector<16x1xf32>
    %12 = arith.addf %10, %11 : vector<16x1xf32>
    %cst_7 = arith.constant 1.000000e-01 : f32
    %13 = vector.broadcast %cst_7 : f32 to vector<16x1xf32>
    %14 = arith.mulf %13, %12 : vector<16x1xf32>
    %15 = tpu.reciprocal %14 : vector<16x1xf32> -> vector<16x1xf32>
    %16 = vector.broadcast %15 : vector<16x1xf32> to vector<16x128xf32>
    %17 = arith.mulf %6, %16 : vector<16x128xf32>
    %c0_8 = arith.constant 0 : index
    %c0_9 = arith.constant 0 : index
    %18 = vector.load %arg4[%c0_8, %c0_9] : memref<1x128xf32, #tpu.memory_space<vmem>>, vector<1x128xf32>
    %19 = vector.broadcast %18 : vector<1x128xf32> to vector<16x128xf32>
    %20 = arith.addf %17, %19 : vector<16x128xf32>
    %cst_10 = arith.constant 1.000000e+01 : f32
    %21 = vector.broadcast %cst_10 : f32 to vector<16x128xf32>
    %22 = arith.subf %20, %21 : vector<16x128xf32>
    %23 = math.exp %22 : vector<16x128xf32>
    %cst_11 = arith.constant dense<0.000000e+00> : vector<16xf32>
    %24 = vector.multi_reduction <add>, %23, %cst_11 [1] : vector<16x128xf32> to vector<16xf32>
    %25 = vector.shape_cast %24 : vector<16xf32> to vector<16x1xf32>
    %26 = math.log %25 : vector<16x1xf32>
    %cst_12 = arith.constant 1.000000e+01 : f32
    %27 = vector.broadcast %cst_12 : f32 to vector<16x1xf32>
    %28 = arith.addf %27, %26 : vector<16x1xf32>
    %29 = tpu.iota {dimensions = array<i32: 1>} : vector<16x128xi32>
    %c0_13 = arith.constant 0 : index
    %c0_14 = arith.constant 0 : index
    %30 = vector.load %arg5[%c0_13, %c0_14] : memref<16x1xi32, #tpu.memory_space<vmem>>, vector<16x1xi32>
    %31 = vector.broadcast %30 : vector<16x1xi32> to vector<16x128xi32>
    %32 = arith.cmpi eq, %29, %31 : vector<16x128xi32>
    %cst_15 = arith.constant 0.000000e+00 : f32
    %33 = vector.broadcast %cst_15 : f32 to vector<16x128xf32>
    %34 = arith.select %32, %20, %33 : vector<16x128xi1>, vector<16x128xf32>
    %cst_16 = arith.constant dense<0.000000e+00> : vector<16xf32>
    %35 = vector.multi_reduction <add>, %34, %cst_16 [1] : vector<16x128xf32> to vector<16xf32>
    %36 = vector.shape_cast %35 : vector<16xf32> to vector<16x1xf32>
    %37 = arith.subf %28, %36 : vector<16x1xf32>
    %c0_17 = arith.constant 0 : index
    %c0_18 = arith.constant 0 : index
    %38 = vector.load %arg6[%c0_17, %c0_18] : memref<16x1xf32, #tpu.memory_space<vmem>>, vector<16x1xf32>
    tpu.vector_store %arg6[%c0_17, %c0_18], %37 {strides = array<i32>} : memref<16x1xf32, #tpu.memory_space<vmem>>, vector<16x1xf32>,
    return
  }
  func.func @transform_0(%arg0: i32) -> (i32, i32) {
    %c0_i32 = arith.constant 0 : i32
    %c0_i32_0 = arith.constant 0 : i32
    return %arg0, %c0_i32 : i32, i32
  }
  func.func @transform_1(%arg0: i32) -> (i32, i32) {
    %c0_i32 = arith.constant 0 : i32
    %c0_i32_0 = arith.constant 0 : i32
    %c0_i32_1 = arith.constant 0 : i32
    return %c0_i32, %c0_i32_0 : i32, i32
  }
  func.func @transform_2(%arg0: i32) -> (i32, i32) {
    %c0_i32 = arith.constant 0 : i32
    %c0_i32_0 = arith.constant 0 : i32
    %c0_i32_1 = arith.constant 0 : i32
    return %c0_i32, %c0_i32_0 : i32, i32
  }
  func.func @transform_3(%arg0: i32) -> (i32, i32) {
    %c0_i32 = arith.constant 0 : i32
    %c0_i32_0 = arith.constant 0 : i32
    %c0_i32_1 = arith.constant 0 : i32
    return %c0_i32, %c0_i32_0 : i32, i32
  }
  func.func @transform_4(%arg0: i32) -> (i32, i32) {
    %c0_i32 = arith.constant 0 : i32
    %c0_i32_0 = arith.constant 0 : i32
    return %arg0, %c0_i32 : i32, i32
  }
  func.func @transform_5(%arg0: i32) -> (i32, i32) {
    %c0_i32 = arith.constant 0 : i32
    %c0_i32_0 = arith.constant 0 : i32
    return %arg0, %c0_i32 : i32, i32
  }
}

</mosaic_0001>

<bundles_post_ra>
// kernel: tpu_custom_call.1
= control target key start
LH: loop header
LB: loop body
LE: loop exit
PB: predicated region body
PF: predicated region fallthrough
CT: control target
= control target key end

     0   :  { %10 = vsyncpa [#allocation3], 0  ;;  %s328_s18 = smov [#allocation2]   ;;  %s400_s0 = inlined_call_operand.vmem [shape: f32[16,128], index: 0, kind: input, shape index: {}]   ;;  %s401_s1 = inlined_call_operand.hbm [shape: bf16[128,128], index: 1, kind: input, shape index: {}]   ;;  %s402_s2 = inlined_call_operand.vmem [shape: f32[1,128], index: 2, kind: input, shape index: {}]   ;;  %s403_s3 = inlined_call_operand.vmem [shape: f32[1,128], index: 3, kind: input, shape index: {}]   ;;  %s404_s4 = inlined_call_operand.vmem [shape: s32[16,1], index: 4, kind: input, shape index: {}]   ;;  %s405_s5 = inlined_call_operand.vmem [shape: f32[16,1], index: 5, kind: output, shape index: {}]  }
   0x1   :  { %s18_s19 = sshll.u32 %s328_s18, 4  ;;  %s304_s22 = scalar_lea.hbm %s401_s1, 1024  ;;  %s19_s19 = int_to_ptr.vmem [resolvable:$true] %s18_s19 }
   0x2   :  { %p305_p0 = scmp.ne.s32.totalorder %s401_s1, %s304_s22  ;;  %p308_p1 = scmp.lt.u32.totalorder %s304_s22, %s401_s1 }
   0x4   :  { %p310_p2 = pnand %p308_p1, %p305_p0 }
   0x6   :  { %313 = shalt.err (!%p310_p2)
}
   0x7   :  { %s314_s27 = scalar_lea.vmem %s19_s19, 1024  ;;  %p319_p4 = scmp.lt.s32.totalorder %s19_s19, %s19_s19 }
   0x8   :  { %p315_p3 = scmp.ne.s32.totalorder %s19_s19, %s314_s27  ;;  %p320_p5 = scmp.lt.s32.totalorder %s314_s27, %s314_s27 }
   0xa   :  { %p321_p6 = por %p320_p5, %p319_p4 }
   0xc   :  { %p322_p7 = pnand %p321_p6, %p315_p3 }
   0xe   :  { %325 = shalt.err (!%p322_p7)
}
   0xf   :  { %s329_s28 = smov 64   ;;  %s330_s29 = smov 4  }
  0x10   :  { %24 = dma.hbm_to_vmem [thread:$0]  %s401_s1, 1024, %s19_s19, [#allocation3], %s329_s28, %s329_s28, %s330_s29  }
  0x11   :  { %326 = dma.done.wait [#allocation3], 1024  }
  0x12   :  { %327 = vsyncadd [#allocation3], 4294966272  ;;  %v331_v0 = vmov 0.0   ;;  %vm332_vm0 = vmmov 0   ;;  %v280_v1 = vld [vmem:[#allocation2] sm:$0xff]   ;;  %v281_v2 = vld [vmem:[#allocation2 + $0x8] sm:$0xff]   ;;  %v203_v51 = vlaneseq }
  0x13   :  { %252 = vmatprep.subr.bf16.mxu0 %v331_v0  ;;  %268 = vmatprep.mubr.msk.bf16.mxu0 %vm332_vm0, %v331_v0  ;;  %v282_v3 = vld [vmem:[#allocation2 + $0x10] sm:$0xff]   ;;  %v283_v4 = vld [vmem:[#allocation2 + $0x18] sm:$0xff]   ;;  %v284_v5 = vld [vmem:[#allocation2 + $0x20] sm:$0xff]   ;;  %v333_v13 = vmov 0   ;;  %vm223_vm7 = vcmask 7168  }
  0x14   :  { %253 = vmatpush3.bf16.msra.mxu0 %v280_v1  ;;  %v285_v6 = vld [vmem:[#allocation2 + $0x28] sm:$0xff]   ;;  %v286_v7 = vld [vmem:[#allocation2 + $0x30] sm:$0xff]   ;;  %v287_v8 = vld [vmem:[#allocation2 + $0x38] sm:$0xff]   ;;  %278 = vset.pattern.permute.xlu1 %v333_v13  ;;  %v204_v53 = vand.u32 127, %v203_v51 }
  0x15   :  { %254 = vmatprep.subr.bf16.mxu0 %v331_v0  ;;  %v35_v9 = vld [vmem:[%s400_s0] sm:$0xff]  ;;  %v36_v10 = vld [vmem:[%s400_s0 + $0x8] sm:$0xff]  ;;  %279 = vset.pattern.permute.xlu0 %v333_v13 }
  0x16   :  { %v37_v11 = vpack.c.bf16 %v36_v10, %v35_v9  ;;  %v205_v12 = vld [vmem:[%s404_s4] sm:$0xff]  ;;  %v206_v14 = vld [vmem:[%s404_s4 + $0x8] sm:$0xff] }
  0x17   :  { %208 = vperm.xlu1 %278, %v205_v12   ;;  %v231_v15 = vld [vmem:[%s402_s2] ss:$0 sm:$0xff] }
  0x18   :  { %255 = vmatpush3.bf16.msra.mxu0 %v281_v2  ;;  %v240_v41 = vld [vmem:[%s403_s3] ss:$0 sm:$0xff] }
  0x19   :  { %256 = vmatprep.subr.bf16.mxu0 %v331_v0 }
  0x1b   :  { %211 = vperm.xlu1 %278, %v206_v14  }
  0x1c   :  { %257 = vmatpush3.bf16.msra.mxu0 %v282_v3 }
  0x1d   :  { %258 = vmatprep.subr.bf16.mxu0 %v331_v0 }
  0x20   :  { %259 = vmatpush3.bf16.msra.mxu0 %v283_v4 }
  0x21   :  { %260 = vmatprep.subr.bf16.mxu0 %v331_v0 }
  0x24   :  { %261 = vmatpush3.bf16.msra.mxu0 %v284_v5 }
  0x25   :  { %262 = vmatprep.subr.bf16.mxu0 %v331_v0 }
  0x28   :  { %263 = vmatpush3.bf16.msra.mxu0 %v285_v6 }
  0x29   :  { %264 = vmatprep.subr.bf16.mxu0 %v331_v0 }
  0x2c   :  { %265 = vmatpush3.bf16.msra.mxu0 %v286_v7 }
  0x2d   :  { %266 = vmatprep.subr.bf16.mxu0 %v331_v0 }
  0x30   :  { %267 = vmatpush3.bf16.msra.mxu0 %v287_v8 }
  0x33   :  { %269 = vmatmul.mubr.bf16.vlgmr.msra.gmra.mrb[0].mxu0 %v37_v11 }
  0x96   :  { %v209_v52 = vpop.permute.xlu1 %208 }
  0x97   :  { %vm213_vm5 = vcmp.eq.s32.totalorder %v204_v53, %v209_v52 }
  0x9a   :  { %v212_v55 = vpop.permute.xlu1 %211 }
  0x9b   :  { %vm214_vm6 = vcmp.eq.s32.totalorder %v204_v53, %v212_v55 }
 0x106   :  { %v143_v16 = vpop.f32.mrb[0].mxu0 }
 0x107   :  { %v144_v17 = vadd.f32 %v231_v15, %v143_v16  ;;  %v270_v18 = vpop.f32.mrb[1].mxu0 }
 0x108   :  { %v146_v19 = vpop.f32.mrb[2].mxu0 }
 0x109   :  { %v147_v20 = vadd.f32 %v231_v15, %v146_v19  ;;  %v271_v21 = vpop.f32.mrb[3].mxu0  ;;  %v150_v22 = vmul.f32 %v144_v17, %v144_v17 }
 0x10b   :  { %152 = vadd.xlane.f32.xlu0 %v150_v22  ;;  %v151_v23 = vmul.f32 %v147_v20, %v147_v20 }
 0x10f   :  { %154 = vadd.xlane.f32.xlu0 %v151_v23 }
 0x198   :  { %v153_v24 = vpop.xlane.xlu0 %152 }
 0x199   :  { %288 = vrsqrt.f32 %v153_v24  ;;  %vm158_vm1 = vcmp.eq.f32.partialorder %v153_v24, inf  ;;  %v161_v28 = vand.u32 2147483648, %v153_v24  ;;  %vm160_vm2 = vcmp.eq.f32.partialorder %v153_v24, 0.0 }
 0x19c   :  { %v155_v25 = vpop.xlane.xlu0 %154 }
 0x19d   :  { %290 = vrsqrt.f32 %v155_v25  ;;  %vm165_vm3 = vcmp.eq.f32.partialorder %v155_v25, inf  ;;  %v168_v34 = vand.u32 2147483648, %v155_v25  ;;  %vm167_vm4 = vcmp.eq.f32.partialorder %v155_v25, 0.0 }
 0x1a3   :  { %v289_v26 = vpop.eup %288 }
 0x1a4   :  { %v157_v27 = vmul.f32 %v289_v26, %v153_v24 }
 0x1a6   :  { %v159_v29 = vsel %vm158_vm1, %v153_v24, %v157_v27 }
 0x1a7   :  { %v291_v30 = vpop.eup %290  ;;  %v162_v31 = vsel %vm160_vm2, %v161_v28, %v159_v29 }
 0x1a8   :  { %v170_v32 = vadd.f32 1e-07, %v162_v31  ;;  %v164_v33 = vmul.f32 %v291_v30, %v155_v25 }
 0x1aa   :  { %v172_v35 = vmul.f32 0.1, %v170_v32  ;;  %v166_v36 = vsel %vm165_vm3, %v155_v25, %v164_v33 }
 0x1ab   :  { %v169_v37 = vsel %vm167_vm4, %v168_v34, %v166_v36 }
 0x1ac   :  { %292 = vrcp.f32 %v172_v35  ;;  %v171_v38 = vadd.f32 1e-07, %v169_v37 }
 0x1ae   :  { %v173_v39 = vmul.f32 0.1, %v171_v38 }
 0x1b0   :  { %294 = vrcp.f32 %v173_v39 }
 0x1b6   :  { %v293_v40 = vpop.eup %292 }
 0x1b7   :  { %v176_v42 = vmul.f32 %v293_v40, %v144_v17 }
 0x1b9   :  { %v185_v43 = vadd.f32 %v240_v41, %v176_v42 }
 0x1ba   :  { %v295_v44 = vpop.eup %294 }
 0x1bb   :  { %v241_v45 = vadd.f32 -10.0, %v185_v43  ;;  %v177_v46 = vmul.f32 %v295_v44, %v147_v20  ;;  %v215_v57 = vsel %vm213_vm5, %v185_v43, 0.0 }
 0x1bd   :  { %v189_v47 = vmul.f32 1.442695, %v241_v45  ;;  %v186_v48 = vadd.f32 %v240_v41, %v177_v46 }
 0x1bf   :  { %296 = vpow2.f32 %v189_v47  ;;  %v242_v49 = vadd.f32 -10.0, %v186_v48  ;;  %v216_v58 = vsel %vm214_vm6, %v186_v48, 0.0 }
 0x1c1   :  { %v191_v50 = vmul.f32 1.442695, %v242_v49 }
 0x1c3   :  { %298 = vpow2.f32 %v191_v50 }
 0x1c9   :  { %v297_v54 = vpop.eup %296 }
 0x1ca   :  { %193 = vadd.xlane.f32.xlu0 %v297_v54 }
 0x1cd   :  { %v299_v56 = vpop.eup %298 }
 0x1ce   :  { %217 = vadd.xlane.f32.xlu0 %v215_v57  ;;  %195 = vadd.xlane.f32.xlu1 %v299_v56 }
 0x1d2   :  { %219 = vadd.xlane.f32.xlu0 %v216_v58 }
 0x257   :  { %v194_v59 = vpop.xlane.xlu0 %193 }
 0x258   :  { %300 = vlog2.f32 %v194_v59 }
 0x25b   :  { %v196_v60 = vpop.xlane.xlu1 %195  ;;  %v218_v63 = vpop.xlane.xlu0 %217 }
 0x25c   :  { %302 = vlog2.f32 %v196_v60 }
 0x25f   :  { %v220_v5 = vpop.xlane.xlu0 %219 }
 0x262   :  { %v301_v61 = vpop.eup %300 }
 0x263   :  { %v198_v62 = vmul.f32 0.6931472, %v301_v61 }
 0x265   :  { %v201_v0 = vadd.f32 10.0, %v198_v62 }
 0x266   :  { %v303_v1 = vpop.eup %302 }
 0x267   :  { %v200_v2 = vmul.f32 0.6931472, %v303_v1  ;;  %v221_v3 = vsub.f32 %v201_v0, %v218_v63 }
 0x269   :  { %224 = vst.msk [vmem:[%s405_s5] sm:$0xff] %vm223_vm7, %v221_v3  ;;  %v202_v4 = vadd.f32 10.0, %v200_v2 }
 0x26b   :  { %v222_v6 = vsub.f32 %v202_v4, %v220_v5 }
 0x26d   :  { %225 = vst.msk [vmem:[%s405_s5 + $0x8] sm:$0xff] %vm223_vm7, %v222_v6 }
 0x26e   :  { %230 = vsyncpa [#allocation3], 1 }

// kernel: tpu_custom_call.1
= control target key start
LH: loop header
LB: loop body
LE: loop exit
PB: predicated region body
PF: predicated region fallthrough
CT: control target
= control target key end

     0   :  { %10 = vsyncpa [#allocation3], 0  ;;  %s328_s18 = smov [#allocation2]   ;;  %s400_s0 = inlined_call_operand.vmem [shape: f32[16,128], index: 0, kind: input, shape index: {}]   ;;  %s401_s1 = inlined_call_operand.hbm [shape: bf16[128,128], index: 1, kind: input, shape index: {}]   ;;  %s402_s2 = inlined_call_operand.vmem [shape: f32[1,128], index: 2, kind: input, shape index: {}]   ;;  %s403_s3 = inlined_call_operand.vmem [shape: f32[1,128], index: 3, kind: input, shape index: {}]   ;;  %s404_s4 = inlined_call_operand.vmem [shape: s32[16,1], index: 4, kind: input, shape index: {}]   ;;  %s405_s5 = inlined_call_operand.vmem [shape: f32[16,1], index: 5, kind: output, shape index: {}]  }
   0x1   :  { %s18_s19 = sshll.u32 %s328_s18, 4  ;;  %s304_s22 = scalar_lea.hbm %s401_s1, 1024  ;;  %s19_s19 = int_to_ptr.vmem [resolvable:$true] %s18_s19 }
   0x2   :  { %p305_p0 = scmp.ne.s32.totalorder %s401_s1, %s304_s22  ;;  %p308_p1 = scmp.lt.u32.totalorder %s304_s22, %s401_s1 }
   0x4   :  { %p310_p2 = pnand %p308_p1, %p305_p0 }
   0x6   :  { %313 = shalt.err (!%p310_p2)
}
   0x7   :  { %s314_s27 = scalar_lea.vmem %s19_s19, 1024  ;;  %p319_p4 = scmp.lt.s32.totalorder %s19_s19, %s19_s19 }
   0x8   :  { %p315_p3 = scmp.ne.s32.totalorder %s19_s19, %s314_s27  ;;  %p320_p5 = scmp.lt.s32.totalorder %s314_s27, %s314_s27 }
   0xa   :  { %p321_p6 = por %p320_p5, %p319_p4 }
   0xc   :  { %p322_p7 = pnand %p321_p6, %p315_p3 }
   0xe   :  { %325 = shalt.err (!%p322_p7)
}
   0xf   :  { %s329_s28 = smov 64   ;;  %s330_s29 = smov 4  }
  0x10   :  { %24 = dma.hbm_to_vmem [thread:$0]  %s401_s1, 1024, %s19_s19, [#allocation3], %s329_s28, %s329_s28, %s330_s29  }
  0x11   :  { %326 = dma.done.wait [#allocation3], 1024  }
  0x12   :  { %327 = vsyncadd [#allocation3], 4294966272  ;;  %v331_v0 = vmov 0.0   ;;  %vm332_vm0 = vmmov 0   ;;  %v280_v1 = vld [vmem:[#allocation2] sm:$0xff]   ;;  %v281_v2 = vld [vmem:[#allocation2 + $0x8] sm:$0xff]   ;;  %v203_v51 = vlaneseq }
  0x13   :  { %252 = vmatprep.subr.bf16.mxu0 %v331_v0  ;;  %268 = vmatprep.mubr.msk.bf16.mxu0 %vm332_vm0, %v331_v0  ;;  %v282_v3 = vld [vmem:[#allocation2 + $0x10] sm:$0xff]   ;;  %v283_v4 = vld [vmem:[#allocation2 + $0x18] sm:$0xff]   ;;  %v284_v5 = vld [vmem:[#allocation2 + $0x20] sm:$0xff]   ;;  %v333_v13 = vmov 0   ;;  %vm223_vm7 = vcmask 7168  }
  0x14   :  { %253 = vmatpush3.bf16.msra.mxu0 %v280_v1  ;;  %v285_v6 = vld [vmem:[#allocation2 + $0x28] sm:$0xff]   ;;  %v286_v7 = vld [vmem:[#allocation2 + $0x30] sm:$0xff]   ;;  %v287_v8 = vld [vmem:[#allocation2 + $0x38] sm:$0xff]   ;;  %278 = vset.pattern.permute.xlu1 %v333_v13  ;;  %v204_v53 = vand.u32 127, %v203_v51 }
  0x15   :  { %254 = vmatprep.subr.bf16.mxu0 %v331_v0  ;;  %v35_v9 = vld [vmem:[%s400_s0] sm:$0xff]  ;;  %v36_v10 = vld [vmem:[%s400_s0 + $0x8] sm:$0xff]  ;;  %279 = vset.pattern.permute.xlu0 %v333_v13 }
  0x16   :  { %v37_v11 = vpack.c.bf16 %v36_v10, %v35_v9  ;;  %v205_v12 = vld [vmem:[%s404_s4] sm:$0xff]  ;;  %v206_v14 = vld [vmem:[%s404_s4 + $0x8] sm:$0xff] }
  0x17   :  { %208 = vperm.xlu1 %278, %v205_v12   ;;  %v231_v15 = vld [vmem:[%s402_s2] ss:$0 sm:$0xff] }
  0x18   :  { %255 = vmatpush3.bf16.msra.mxu0 %v281_v2  ;;  %v240_v41 = vld [vmem:[%s403_s3] ss:$0 sm:$0xff] }
  0x19   :  { %256 = vmatprep.subr.bf16.mxu0 %v331_v0 }
  0x1b   :  { %211 = vperm.xlu1 %278, %v206_v14  }
  0x1c   :  { %257 = vmatpush3.bf16.msra.mxu0 %v282_v3 }
  0x1d   :  { %258 = vmatprep.subr.bf16.mxu0 %v331_v0 }
  0x20   :  { %259 = vmatpush3.bf16.msra.mxu0 %v283_v4 }
  0x21   :  { %260 = vmatprep.subr.bf16.mxu0 %v331_v0 }
  0x24   :  { %261 = vmatpush3.bf16.msra.mxu0 %v284_v5 }
  0x25   :  { %262 = vmatprep.subr.bf16.mxu0 %v331_v0 }
  0x28   :  { %263 = vmatpush3.bf16.msra.mxu0 %v285_v6 }
  0x29   :  { %264 = vmatprep.subr.bf16.mxu0 %v331_v0 }
  0x2c   :  { %265 = vmatpush3.bf16.msra.mxu0 %v286_v7 }
  0x2d   :  { %266 = vmatprep.subr.bf16.mxu0 %v331_v0 }
  0x30   :  { %267 = vmatpush3.bf16.msra.mxu0 %v287_v8 }
  0x33   :  { %269 = vmatmul.mubr.bf16.vlgmr.msra.gmra.mrb[0].mxu0 %v37_v11 }
  0x96   :  { %v209_v52 = vpop.permute.xlu1 %208 }
  0x97   :  { %vm213_vm5 = vcmp.eq.s32.totalorder %v204_v53, %v209_v52 }
  0x9a   :  { %v212_v55 = vpop.permute.xlu1 %211 }
  0x9b   :  { %vm214_vm6 = vcmp.eq.s32.totalorder %v204_v53, %v212_v55 }
 0x106   :  { %v143_v16 = vpop.f32.mrb[0].mxu0 }
 0x107   :  { %v144_v17 = vadd.f32 %v231_v15, %v143_v16  ;;  %v270_v18 = vpop.f32.mrb[1].mxu0 }
 0x108   :  { %v146_v19 = vpop.f32.mrb[2].mxu0 }
 0x109   :  { %v147_v20 = vadd.f32 %v231_v15, %v146_v19  ;;  %v271_v21 = vpop.f32.mrb[3].mxu0  ;;  %v150_v22 = vmul.f32 %v144_v17, %v144_v17 }
 0x10b   :  { %152 = vadd.xlane.f32.xlu0 %v150_v22  ;;  %v151_v23 = vmul.f32 %v147_v20, %v147_v20 }
 0x10f   :  { %154 = vadd.xlane.f32.xlu0 %v151_v23 }
 0x198   :  { %v153_v24 = vpop.xlane.xlu0 %152 }
 0x199   :  { %288 = vrsqrt.f32 %v153_v24  ;;  %vm158_vm1 = vcmp.eq.f32.partialorder %v153_v24, inf  ;;  %v161_v28 = vand.u32 2147483648, %v153_v24  ;;  %vm160_vm2 = vcmp.eq.f32.partialorder %v153_v24, 0.0 }
 0x19c   :  { %v155_v25 = vpop.xlane.xlu0 %154 }
 0x19d   :  { %290 = vrsqrt.f32 %v155_v25  ;;  %vm165_vm3 = vcmp.eq.f32.partialorder %v155_v25, inf  ;;  %v168_v34 = vand.u32 2147483648, %v155_v25  ;;  %vm167_vm4 = vcmp.eq.f32.partialorder %v155_v25, 0.0 }
 0x1a3   :  { %v289_v26 = vpop.eup %288 }
 0x1a4   :  { %v157_v27 = vmul.f32 %v289_v26, %v153_v24 }
 0x1a6   :  { %v159_v29 = vsel %vm158_vm1, %v153_v24, %v157_v27 }
 0x1a7   :  { %v291_v30 = vpop.eup %290  ;;  %v162_v31 = vsel %vm160_vm2, %v161_v28, %v159_v29 }
 0x1a8   :  { %v170_v32 = vadd.f32 1e-07, %v162_v31  ;;  %v164_v33 = vmul.f32 %v291_v30, %v155_v25 }
 0x1aa   :  { %v172_v35 = vmul.f32 0.1, %v170_v32  ;;  %v166_v36 = vsel %vm165_vm3, %v155_v25, %v164_v33 }
 0x1ab   :  { %v169_v37 = vsel %vm167_vm4, %v168_v34, %v166_v36 }
 0x1ac   :  { %292 = vrcp.f32 %v172_v35  ;;  %v171_v38 = vadd.f32 1e-07, %v169_v37 }
 0x1ae   :  { %v173_v39 = vmul.f32 0.1, %v171_v38 }
 0x1b0   :  { %294 = vrcp.f32 %v173_v39 }
 0x1b6   :  { %v293_v40 = vpop.eup %292 }
 0x1b7   :  { %v176_v42 = vmul.f32 %v293_v40, %v144_v17 }
 0x1b9   :  { %v185_v43 = vadd.f32 %v240_v41, %v176_v42 }
 0x1ba   :  { %v295_v44 = vpop.eup %294 }
 0x1bb   :  { %v241_v45 = vadd.f32 -10.0, %v185_v43  ;;  %v177_v46 = vmul.f32 %v295_v44, %v147_v20  ;;  %v215_v57 = vsel %vm213_vm5, %v185_v43, 0.0 }
 0x1bd   :  { %v189_v47 = vmul.f32 1.442695, %v241_v45  ;;  %v186_v48 = vadd.f32 %v240_v41, %v177_v46 }
 0x1bf   :  { %296 = vpow2.f32 %v189_v47  ;;  %v242_v49 = vadd.f32 -10.0, %v186_v48  ;;  %v216_v58 = vsel %vm214_vm6, %v186_v48, 0.0 }
 0x1c1   :  { %v191_v50 = vmul.f32 1.442695, %v242_v49 }
 0x1c3   :  { %298 = vpow2.f32 %v191_v50 }
 0x1c9   :  { %v297_v54 = vpop.eup %296 }
 0x1ca   :  { %193 = vadd.xlane.f32.xlu0 %v297_v54 }
 0x1cd   :  { %v299_v56 = vpop.eup %298 }
 0x1ce   :  { %217 = vadd.xlane.f32.xlu0 %v215_v57  ;;  %195 = vadd.xlane.f32.xlu1 %v299_v56 }
 0x1d2   :  { %219 = vadd.xlane.f32.xlu0 %v216_v58 }
 0x257   :  { %v194_v59 = vpop.xlane.xlu0 %193 }
 0x258   :  { %300 = vlog2.f32 %v194_v59 }
 0x25b   :  { %v196_v60 = vpop.xlane.xlu1 %195  ;;  %v218_v63 = vpop.xlane.xlu0 %217 }
 0x25c   :  { %302 = vlog2.f32 %v196_v60 }
 0x25f   :  { %v220_v5 = vpop.xlane.xlu0 %219 }
 0x262   :  { %v301_v61 = vpop.eup %300 }
 0x263   :  { %v198_v62 = vmul.f32 0.6931472, %v301_v61 }
 0x265   :  { %v201_v0 = vadd.f32 10.0, %v198_v62 }
 0x266   :  { %v303_v1 = vpop.eup %302 }
 0x267   :  { %v200_v2 = vmul.f32 0.6931472, %v303_v1  ;;  %v221_v3 = vsub.f32 %v201_v0, %v218_v63 }
 0x269   :  { %224 = vst.msk [vmem:[%s405_s5] sm:$0xff] %vm223_vm7, %v221_v3  ;;  %v202_v4 = vadd.f32 10.0, %v200_v2 }
 0x26b   :  { %v222_v6 = vsub.f32 %v202_v4, %v220_v5 }
 0x26d   :  { %225 = vst.msk [vmem:[%s405_s5 + $0x8] sm:$0xff] %vm223_vm7, %v222_v6 }
 0x26e   :  { %230 = vsyncpa [#allocation3], 1 }

</bundles_post_ra>
